<compile_context>
chip_gen: v5e
topology: v5e:2x2
jax: 0.10.0
libtpu: 0.0.40
codegen_flags: <defaults>
</compile_context>

<pallas_src>
import functools

import jax
import jax.numpy as jnp
from jax.experimental import pallas as pl
from jax.experimental.pallas import tpu as pltpu


def _round_up(n, m):
    return ((n + m - 1) // m) * m


def mlp_forward_kernel(x_ref, w1_ref, b1_ref, w2_ref, b2_ref, w3_ref, b3_ref,
                       o_ref, *, use_bf16_matmul=False):
    """One batch tile of the MLP, batch-in-lanes layout.

    x_ref : (d_in,  tile_b)  spatial coords, batch on the lane axis
    wN_ref: (out_N, in_N)    PyTorch-native nn.Linear weight layout
    bN_ref: (out_N, 1)       bias column (broadcast across lanes)
    o_ref : (d_out, tile_b)
    """
    x = x_ref[...].astype(jnp.float32)                  # (d_in, tile_b)
    d_in = x_ref.shape[0]

    # Layer 1: K == d_in (= 2) is far below MXU granularity -> unrolled VPU
    # broadcast FMAs producing a fully lane-dense (d_h1, tile_b) activation.
    h = b1_ref[...] + w1_ref[:, 0:1] * x[0:1, :]
    for k in range(1, d_in):
        h = h + w1_ref[:, k:k + 1] * x[k:k + 1, :]
    h = jnp.tanh(h)                                      # (d_h1, tile_b)

    def mm(w, a):
        if use_bf16_matmul:
            return jnp.dot(w.astype(jnp.bfloat16), a.astype(jnp.bfloat16),
                           preferred_element_type=jnp.float32)
        return jnp.dot(w, a, preferred_element_type=jnp.float32)

    # Layer 2: (d_h2, d_h1) @ (d_h1, tile_b) -> lane-dense MXU matmul.
    h = jnp.tanh(mm(w2_ref[...], h) + b2_ref[...])       # (d_h2, tile_b)

    # Layer 3: (d_out, d_h2) @ (d_h2, tile_b); d_out == 1 is only a handful of
    # MXU pushes in this layout (vs ~tile_b/8 in the batch-in-sublanes layout).
    out = mm(w3_ref[...], h) + b3_ref[...]               # (d_out, tile_b)
    o_ref[...] = out.astype(o_ref.dtype)


def gpe_pinn_forward(x, params, *, target_tile=2048, min_core_split=2,
                     use_bf16_matmul=False):
    """Pallas-accelerated forward pass of GrossPitaevskiiPINN.network.

    x: (N, d_in) float32 spatial points (any N >= 1).
    params: list of (W, b) with W: (out_i, in_i) (PyTorch layout), b: (out_i, 1).
    Returns (N, d_out) float32.
    """
    (w1, b1), (w2, b2), (w3, b3) = params
    N, d_in = x.shape
    d_h1 = w1.shape[0]
    d_h2 = w2.shape[0]
    d_out = w3.shape[0]

    # Batch on the lane axis; the transpose of an (N, 2) array is negligible.
    x_t = x.T                                            # (d_in, N)

    # Tile selection: multiple of 128 lanes (layout requirement), big enough to
    # amortize the ~0.35us per-step pipeline overhead, but capped at half the
    # batch so v7x's two TensorCores both get work once N >= 256. No full-tile
    # padding: the ragged last block is handled by Pallas masked reads/writes.
    lane_n = _round_up(N, 128)
    tile_b = min(target_tile, lane_n)
    if min_core_split > 1 and lane_n >= min_core_split * 128:
        tile_b = min(tile_b, _round_up(pl.cdiv(lane_n, min_core_split), 128))
    grid = (pl.cdiv(N, tile_b),)

    def full_spec(shape):
        # Grid-invariant weights/biases: same block every step, no re-DMA.
        return pl.BlockSpec(shape, lambda i: tuple(0 for _ in shape))

    kernel = functools.partial(mlp_forward_kernel, use_bf16_matmul=use_bf16_matmul)

    out_t = pl.pallas_call(
        kernel,
        out_shape=jax.ShapeDtypeStruct((d_out, N), jnp.float32),
        grid_spec=pltpu.PrefetchScalarGridSpec(
            num_scalar_prefetch=0,
            grid=grid,
            in_specs=[
                pl.BlockSpec((d_in, tile_b), lambda i: (0, i)),
                full_spec((d_h1, d_in)),
                full_spec((d_h1, 1)),
                full_spec((d_h2, d_h1)),
                full_spec((d_h2, 1)),
                full_spec((d_out, d_h2)),
                full_spec((d_out, 1)),
            ],
            out_specs=pl.BlockSpec((d_out, tile_b), lambda i: (0, i)),
        ),
        compiler_params=pltpu.CompilerParams(
            dimension_semantics=("parallel",),
        ),
    )(x_t, w1, b1, w2, b2, w3, b3)

    return out_t.T                                       # (N, d_out)


def init_params(key, layers):
    """PyTorch nn.Linear default init: U(-1/sqrt(fan_in), 1/sqrt(fan_in)).

    Weights stored in PyTorch-native (out_features, in_features) layout;
    biases stored as (out_features, 1) columns.
    """
    params = []
    for i in range(len(layers) - 1):
        fan_in, fan_out = layers[i], layers[i + 1]
        key, kw, kb = jax.random.split(key, 3)
        bound = 1.0 / jnp.sqrt(fan_in)
        w = jax.random.uniform(kw, (fan_out, fan_in), jnp.float32, -bound, bound)
        b = jax.random.uniform(kb, (fan_out, 1), jnp.float32, -bound, bound)
        params.append((w, b))
    return params


def reference_forward(x, params):
    """Pure-JAX reference matching torch nn.Sequential(Linear, Tanh, ...)."""
    h = x
    n = len(params)
    for i, (w, b) in enumerate(params):
        h = h @ w.T + b.T
        if i < n - 1:
            h = jnp.tanh(h)
    return h


if __name__ == "__main__":
    # Network architecture: 2 spatial coords -> 64 -> 64 -> 1 (predicted wavefunction u)
    layers = [2, 64, 64, 1]
    key = jax.random.PRNGKey(0)
    key, kx = jax.random.split(key)
    params = init_params(key, layers)

    # Case 1: N=200 -> tile_b=128 (dual-TC cap), 2 grid steps, ragged last block.
    N1 = 200
    x1 = jax.random.uniform(kx, (N1, 2), jnp.float32, 0.0, jnp.pi)
    out1 = jax.block_until_ready(gpe_pinn_forward(x1, params))
    ref1 = reference_forward(x1, params)
    assert out1.shape == (N1, 1)
    assert jnp.allclose(out1, ref1, atol=1e-5, rtol=1e-5), "case 1 mismatch"

    # Case 2: N=300 with default target_tile -> tile_b=256, 2 steps, partial tail.
    N2 = 300
    key, kx2 = jax.random.split(key)
    x2 = jax.random.uniform(kx2, (N2, 2), jnp.float32, 0.0, jnp.pi)
    out2 = jax.block_until_ready(gpe_pinn_forward(x2, params))
    ref2 = reference_forward(x2, params)
    assert out2.shape == (N2, 1)
    assert jnp.allclose(out2, ref2, atol=1e-5, rtol=1e-5), "case 2 mismatch"

    # Case 3: forced multi-step grid (3 steps, last one ragged), no core split.
    N3 = 640
    key, kx3 = jax.random.split(key)
    x3 = jax.random.uniform(kx3, (N3, 2), jnp.float32, 0.0, jnp.pi)
    out3 = jax.block_until_ready(
        gpe_pinn_forward(x3, params, target_tile=256, min_core_split=1))
    ref3 = reference_forward(x3, params)
    assert out3.shape == (N3, 1)
    assert jnp.allclose(out3, ref3, atol=1e-5, rtol=1e-5), "case 3 mismatch"

    print("KERNEL_OK")
</pallas_src>

<mosaic_0001>
module attributes {stable_mosaic.version = 11 : i64} {
  func.func @mlp_forward_kernel(%arg0: i32, %arg1: memref<2x128xf32, #tpu.memory_space<vmem>>, %arg2: memref<64x2xf32, #tpu.memory_space<vmem>>, %arg3: memref<64x1xf32, #tpu.memory_space<vmem>>, %arg4: memref<64x64xf32, #tpu.memory_space<vmem>>, %arg5: memref<64x1xf32, #tpu.memory_space<vmem>>, %arg6: memref<1x64xf32, #tpu.memory_space<vmem>>, %arg7: memref<1x1xf32, #tpu.memory_space<vmem>>, %arg8: memref<1x128xf32, #tpu.memory_space<vmem>>) attributes {dimension_semantics = [#tpu.dimension_semantics<parallel>], iteration_bounds = array<i64: 2>, scalar_prefetch = 0 : i64, scratch_operands = 0 : i64, tpu.core_type = #tpu.core_type<tc>, window_params = [{transform_indices = @transform_0, window_bounds = array<i64: 2, 128>}, {pipeline_mode = #tpu.pipeline_mode<synchronous>, transform_indices = @transform_1, window_bounds = array<i64: 64, 2>}, {pipeline_mode = #tpu.pipeline_mode<synchronous>, transform_indices = @transform_2, window_bounds = array<i64: 64, 1>}, {pipeline_mode = #tpu.pipeline_mode<synchronous>, transform_indices = @transform_3, window_bounds = array<i64: 64, 64>}, {pipeline_mode = #tpu.pipeline_mode<synchronous>, transform_indices = @transform_4, window_bounds = array<i64: 64, 1>}, {pipeline_mode = #tpu.pipeline_mode<synchronous>, transform_indices = @transform_5, window_bounds = array<i64: 1, 64>}, {pipeline_mode = #tpu.pipeline_mode<synchronous>, transform_indices = @transform_6, window_bounds = array<i64: 1, 1>}, {transform_indices = @transform_7, window_bounds = array<i64: 1, 128>}]} {
    %c0 = arith.constant 0 : index
    %c0_0 = arith.constant 0 : index
    %0 = vector.load %arg1[%c0, %c0_0] : memref<2x128xf32, #tpu.memory_space<vmem>>, vector<2x128xf32>
    %c0_1 = arith.constant 0 : index
    %c0_2 = arith.constant 0 : index
    %1 = vector.load %arg3[%c0_1, %c0_2] : memref<64x1xf32, #tpu.memory_space<vmem>>, vector<64x1xf32>
    %c0_3 = arith.constant 0 : index
    %c0_4 = arith.constant 0 : index
    %2 = vector.load %arg2[%c0_3, %c0_4] : memref<64x2xf32, #tpu.memory_space<vmem>>, vector<64x1xf32>
    %3 = vector.extract_strided_slice %0 {offsets = [0, 0], sizes = [1, 128], strides = [1, 1]} : vector<2x128xf32> to vector<1x128xf32>
    %4 = vector.broadcast %2 : vector<64x1xf32> to vector<64x128xf32>
    %5 = vector.broadcast %3 : vector<1x128xf32> to vector<64x128xf32>
    %6 = arith.mulf %4, %5 : vector<64x128xf32>
    %7 = vector.broadcast %1 : vector<64x1xf32> to vector<64x128xf32>
    %8 = arith.addf %7, %6 : vector<64x128xf32>
    %c0_5 = arith.constant 0 : index
    %c1 = arith.constant 1 : index
    %9 = vector.load %arg2[%c0_5, %c1] : memref<64x2xf32, #tpu.memory_space<vmem>>, vector<64x1xf32>
    %10 = vector.extract_strided_slice %0 {offsets = [1, 0], sizes = [1, 128], strides = [1, 1]} : vector<2x128xf32> to vector<1x128xf32>
    %11 = vector.broadcast %9 : vector<64x1xf32> to vector<64x128xf32>
    %12 = vector.broadcast %10 : vector<1x128xf32> to vector<64x128xf32>
    %13 = arith.mulf %11, %12 : vector<64x128xf32>
    %14 = arith.addf %8, %13 : vector<64x128xf32>
    %15 = math.tanh %14 : vector<64x128xf32>
    %c0_6 = arith.constant 0 : index
    %c0_7 = arith.constant 0 : index
    %16 = vector.load %arg4[%c0_6, %c0_7] : memref<64x64xf32, #tpu.memory_space<vmem>>, vector<64x64xf32>
    %cst = arith.constant dense<0.000000e+00> : vector<64x128xf32>
    %17 = tpu.matmul %16, %15, %cst {dimension_numbers = #tpu.dot_dimension_numbers<[1], [0], [0], [1], [0, 0, 1, 1], [], []>} : vector<64x64xf32>, vector<64x128xf32>, vector<64x128xf32> -> vector<64x128xf32>
    %c0_8 = arith.constant 0 : index
    %c0_9 = arith.constant 0 : index
    %18 = vector.load %arg5[%c0_8, %c0_9] : memref<64x1xf32, #tpu.memory_space<vmem>>, vector<64x1xf32>
    %19 = vector.broadcast %18 : vector<64x1xf32> to vector<64x128xf32>
    %20 = arith.addf %17, %19 : vector<64x128xf32>
    %21 = math.tanh %20 : vector<64x128xf32>
    %c0_10 = arith.constant 0 : index
    %c0_11 = arith.constant 0 : index
    %22 = vector.load %arg6[%c0_10, %c0_11] : memref<1x64xf32, #tpu.memory_space<vmem>>, vector<1x64xf32>
    %cst_12 = arith.constant dense<0.000000e+00> : vector<1x128xf32>
    %23 = tpu.matmul %22, %21, %cst_12 {dimension_numbers = #tpu.dot_dimension_numbers<[1], [0], [0], [1], [0, 0, 1, 1], [], []>} : vector<1x64xf32>, vector<64x128xf32>, vector<1x128xf32> -> vector<1x128xf32>
    %c0_13 = arith.constant 0 : index
    %c0_14 = arith.constant 0 : index
    %24 = vector.load %arg7[%c0_13, %c0_14] : memref<1x1xf32, #tpu.memory_space<vmem>>, vector<1x1xf32>
    %25 = vector.broadcast %24 : vector<1x1xf32> to vector<1x128xf32>
    %26 = arith.addf %23, %25 : vector<1x128xf32>
    %c0_15 = arith.constant 0 : index
    %c0_16 = arith.constant 0 : index
    %27 = vector.load %arg8[%c0_15, %c0_16] : memref<1x128xf32, #tpu.memory_space<vmem>>, vector<1x128xf32>
    tpu.vector_store %arg8[%c0_15, %c0_16], %26 {strides = array<i32>} : memref<1x128xf32, #tpu.memory_space<vmem>>, vector<1x128xf32>,
    return
  }
  func.func @transform_0(%arg0: i32) -> (i32, i32) {
    %c0_i32 = arith.constant 0 : i32
    %c0_i32_0 = arith.constant 0 : i32
    return %c0_i32, %arg0 : i32, i32
  }
  func.func @transform_1(%arg0: i32) -> (i32, i32) {
    %c0_i32 = arith.constant 0 : i32
    %c0_i32_0 = arith.constant 0 : i32
    %c0_i32_1 = arith.constant 0 : i32
    return %c0_i32, %c0_i32_0 : i32, i32
  }
  func.func @transform_2(%arg0: i32) -> (i32, i32) {
    %c0_i32 = arith.constant 0 : i32
    %c0_i32_0 = arith.constant 0 : i32
    %c0_i32_1 = arith.constant 0 : i32
    return %c0_i32, %c0_i32_0 : i32, i32
  }
  func.func @transform_3(%arg0: i32) -> (i32, i32) {
    %c0_i32 = arith.constant 0 : i32
    %c0_i32_0 = arith.constant 0 : i32
    %c0_i32_1 = arith.constant 0 : i32
    return %c0_i32, %c0_i32_0 : i32, i32
  }
  func.func @transform_4(%arg0: i32) -> (i32, i32) {
    %c0_i32 = arith.constant 0 : i32
    %c0_i32_0 = arith.constant 0 : i32
    %c0_i32_1 = arith.constant 0 : i32
    return %c0_i32, %c0_i32_0 : i32, i32
  }
  func.func @transform_5(%arg0: i32) -> (i32, i32) {
    %c0_i32 = arith.constant 0 : i32
    %c0_i32_0 = arith.constant 0 : i32
    %c0_i32_1 = arith.constant 0 : i32
    return %c0_i32, %c0_i32_0 : i32, i32
  }
  func.func @transform_6(%arg0: i32) -> (i32, i32) {
    %c0_i32 = arith.constant 0 : i32
    %c0_i32_0 = arith.constant 0 : i32
    %c0_i32_1 = arith.constant 0 : i32
    return %c0_i32, %c0_i32_0 : i32, i32
  }
  func.func @transform_7(%arg0: i32) -> (i32, i32) {
    %c0_i32 = arith.constant 0 : i32
    %c0_i32_0 = arith.constant 0 : i32
    return %c0_i32, %arg0 : i32, i32
  }
}

</mosaic_0001>

<bundles_post_ra>
// kernel: tpu_custom_call.1
= control target key start
LH: loop header
LB: loop body
LE: loop exit
PB: predicated region body
PF: predicated region fallthrough
CT: control target
= control target key end

     0   :  { %s1115_s0 = inlined_call_operand.vmem [shape: f32[2,200], index: 0, kind: input, shape index: {}]   ;;  %s1116_s1 = inlined_call_operand.vmem [shape: f32[64,2], index: 1, kind: input, shape index: {}]   ;;  %s1117_s2 = inlined_call_operand.vmem [shape: f32[64,1], index: 2, kind: input, shape index: {}]   ;;  %s1118_s3 = inlined_call_operand.vmem [shape: f32[64,64], index: 3, kind: input, shape index: {}]   ;;  %s1119_s4 = inlined_call_operand.vmem [shape: f32[64,1], index: 4, kind: input, shape index: {}]   ;;  %s1120_s5 = inlined_call_operand.vmem [shape: f32[1,64], index: 5, kind: input, shape index: {}]   ;;  %s1121_s6 = inlined_call_operand.<no memory space> [shape: f32[1,1], index: 6, kind: input, shape index: {}]   ;;  %s1122_s7 = inlined_call_operand.hbm [shape: f32[1,200], index: 7, kind: output, shape index: {}]  }
   0x1   :  { %v12_v0 = vstv %s1121_s6 }
   0x2   :  { %13 = vst [vmem:[#allocation2] sm:$0x1] %v12_v0 }
   0x3   :  { %14 = vsyncpa [#allocation4], 0 }
   0x4   :  { %16 = vsyncpa [#allocation4 + $0x1], 0  ;;  %s902_s26 = smov 0   ;;  %s904_s27 = smov 0  }
   0x5   :  { %s906_s28 = smov 0   ;;  %s908_s29 = smov 0  }
   0x6 LB: > { %s923_s6 = sadd.s32 4294967295, %s855_s29   ;;  %s676_s30 = sadd.s32 4294967294, %s855_s29   ;;  %s855_s29 = sphi %s908_s29, %s1128_s29   ;;  %s851_s28 = sphi %s906_s28, %s1127_s28   ;;  %s847_s27 = sphi %s904_s27, %s1126_s27   ;;  %s843_s26 = sphi %s902_s26, %s1125_s26  }
   0x7   : > { %s927_s8 = sadd.s32 1, %s855_s29   ;;  %s181_s9 = sadd.s32 1, %s851_s28 }
   0x8   : > { %s178_s10 = ssub.s32 %s855_s29, %s927_s8  ;;  %p191_p0 = scmp.ne.s32.totalorder %s851_s28, %s847_s27 }
   0x9   : > { %p179_p1 = scmp.eq.s32.totalorder %s178_s10, 0  ;;  %p192_p2 = scmp.eq.s32.totalorder %s923_s6, 1 }
   0xa   : > { %p197_p3 = scmp.ne.s32.totalorder %s847_s27, %s843_s26  ;;  %p198_p4 = scmp.eq.s32.totalorder %s676_s30, 1 }
   0xb   : > { %s938_s11 = scalar_select %p179_p1, %s851_s28, %s181_s9  }
   0xc   : > { %p940_p5 = por %p192_p2, %p191_p0  ;;  %p944_p6 = por %p198_p4, %p197_p3 }
   0xd   : > { %p679_p7 = scmp.ge.s32.totalorder %s855_s29, 1  ;;  %p241_p8 = scmp.lt.s32.totalorder %s855_s29, 3 }
   0xf   : > { %p242_p9 = pnand %p679_p7, %p241_p8 }
  0x10   : > { %p271_p10 = scmp.lt.s32.totalorder (!%p242_p9), %s923_s6, 1  ;;  %s269_s25 = sand.u32 (!%p242_p9), 1, %s847_s27  }
  0x11   : > { %245 = sbr.rel (%p242_p9) target bundleno = 524 (0x20c), region = 48  ;;  %s617_s10 = scalar_lea.hbm (!%p242_p9), %s1122_s7, %s923_s6 }
  0x12   : > { %s270_s14 = scalar_lea.vmem (!%p242_p9), [#allocation3], %s269_s25  ;;  %s621_s16 = sshll.u32 (!%p242_p9), %s617_s10, 4  ;;  %s622_s16 = int_to_ptr.hbm [resolvable:$true] %s621_s16 }
  0x13   : > { %s619_s15 = sshll.u32 (!%p242_p9), %s270_s14, 4  ;;  %s609_s17 = scalar_lea.sflag (!%p242_p9), [#allocation4], %s269_s25  ;;  %s620_s15 = int_to_ptr.vmem [resolvable:$true] %s619_s15 }
  0x14   : > { %s807_s18 = sshra.s32 (!%p242_p9), %s622_s16, 4  ;;  %s813_s21 = scalar_lea.hbm (!%p242_p9), %s1122_s7, 2  ;;  %s808_s18 = int_to_ptr.hbm [resolvable:$true] %s807_s18 }
  0x15   : > { %s809_s19 = scalar_lea.hbm (!%p242_p9), %s808_s18, 1  ;;  %p814_p0 = scmp.lt.s32.totalorder (!%p242_p9), %s808_s18, %s1122_s7 }
  0x16   : > { %v290_v1 = vld [vmem:[%s1116_s1 + $0x30] sm:$0xff]  ;;  %v283_v2 = vld [vmem:[%s1117_s2 + $0x38] sm:$0xff]  ;;  %v857_v3 = vmov 1   ;;  %v858_v4 = vmov 0   ;;  %v289_v5 = vld [vmem:[%s1116_s1 + $0x28] sm:$0xff]  ;;  %s272_s22 = scalar_select %p271_p10, %s923_s6, 1 }
  0x17   : > { %752 = vset.pattern.permute.xlu0 %v857_v3  ;;  %749 = vset.pattern.permute.xlu1 %v858_v4  ;;  %v291_v6 = vld [vmem:[%s1116_s1 + $0x38] sm:$0xff]  ;;  %v282_v7 = vld [vmem:[%s1117_s2 + $0x30] sm:$0xff]  ;;  %v288_v8 = vld [vmem:[%s1116_s1 + $0x20] sm:$0xff]  ;;  %vm502_vm0 = vcmask 523264   ;;  %p810_p11 = scmp.ne.s32.totalorder %s808_s18, %s809_s19  ;;  %p815_p1 = scmp.lt.s32.totalorder %s813_s21, %s809_s19 }
  0x18   : > { %414 = vperm.xlu0 %752, %v290_v1   ;;  %378 = vperm.xlu1 %749, %v283_v2   ;;  %v281_v9 = vld [vmem:[%s1117_s2 + $0x28] sm:$0xff]  ;;  %v280_v10 = vld [vmem:[%s1117_s2 + $0x20] sm:$0xff]  ;;  %v287_v11 = vld [vmem:[%s1116_s1 + $0x18] sm:$0xff]  ;;  %s680_s23 = sshll.u32 %s272_s22, 1 }
  0x19   : > { %751 = vset.pattern.permute.xlu2 %v858_v4  ;;  %v285_v12 = vld [vmem:[%s1116_s1 + $0x8] sm:$0xff]  ;;  %v286_v13 = vld [vmem:[%s1116_s1 + $0x10] sm:$0xff]  ;;  %v284_v14 = vld [vmem:[%s1116_s1] sm:$0xff]  ;;  %s274_s30 = scalar_lea.vmem %s1115_s0, %s680_s23  ;;  %p811_p12 = pnand %p810_p11, %p940_p5 }
  0x1a   : > { %319 = vperm.xlu2 %751, %v289_v5   ;;  %v279_v15 = vld [vmem:[%s1117_s2 + $0x18] sm:$0xff]  ;;  %v276_v16 = vld [vmem:[%s1117_s2] sm:$0xff]  ;;  %v278_v17 = vld [vmem:[%s1117_s2 + $0x10] sm:$0xff]  ;;  %p816_p2 = por %p815_p1, %p814_p0 }
  0x1b   : > { %v460_v18 = vld [vmem:[%s1119_s4 + $0x30] sm:$0xff]  ;;  %v277_v19 = vld [vmem:[%s1117_s2 + $0x8] sm:$0xff]  ;;  %v457_v20 = vld [vmem:[%s1119_s4 + $0x18] sm:$0xff]  ;;  %p812_p13 = pneg %p811_p12 }
  0x1c   : > { %v454_v21 = vld [vmem:[%s1119_s4] sm:$0xff] }
  0x1d   : > { %v275_v26 = vld [vmem:[%s274_s30] sm:$0x3]  ;;  %p817_p3 = pnand %p816_p2, %p812_p13 }
  0x1e   : > { %v1012_v27 = vperm.slane %v275_v26, 0  ;;  %v1014_v28 = vperm.slane %v275_v26, 1 }
  0x20   : > { %753 = vset.pattern.permute.xlu0 %v858_v4  ;;  %750 = vset.pattern.permute.xlu1 %v857_v3 }
  0x21   : > { %329 = vperm.xlu0 %753, %v291_v6   ;;  %418 = vperm.xlu1 %750, %v291_v6  }
  0x22   : > { %373 = vperm.xlu2 %751, %v282_v7  }
  0x29   : > { %324 = vperm.xlu0 %753, %v290_v1   ;;  %754 = vset.pattern.permute.xlu1 %v858_v4 }
  0x2a   : > { %314 = vperm.xlu1 %754, %v288_v8   ;;  %368 = vperm.xlu2 %751, %v281_v9  }
  0x31   : > { %363 = vperm.xlu0 %753, %v280_v10  }
  0x32   : > { %755 = vset.pattern.permute.xlu1 %v857_v3  ;;  %309 = vperm.xlu2 %751, %v287_v11  }
  0x33   : > { %410 = vperm.xlu1 %755, %v289_v5  }
  0x39   : > { %299 = vperm.xlu0 %753, %v285_v12  }
  0x3a   : > { %304 = vperm.xlu2 %751, %v286_v13  }
  0x3b   : > { %406 = vperm.xlu1 %755, %v288_v8  }
  0x41   : > { %294 = vperm.xlu0 %753, %v284_v14  }
  0x42   : > { %757 = vset.pattern.permute.xlu2 %v857_v3 }
  0x43   : > { %756 = vset.pattern.permute.xlu1 %v858_v4  ;;  %402 = vperm.xlu2 %757, %v287_v11  }
  0x44   : > { %358 = vperm.xlu1 %756, %v279_v15  }
  0x49   : > { %343 = vperm.xlu0 %753, %v276_v16  }
  0x4b   : > { %398 = vperm.xlu2 %757, %v286_v13  }
  0x4c   : > { %353 = vperm.xlu1 %756, %v278_v17  }
  0x51   : > { %494 = vperm.xlu0 %753, %v460_v18  }
  0x53   : > { %394 = vperm.xlu2 %757, %v285_v12   ;;  %v459_v12 = vld [vmem:[%s1119_s4 + $0x28] sm:$0xff] }
  0x54   : > { %348 = vperm.xlu1 %756, %v277_v19   ;;  %v456_v19 = vld [vmem:[%s1119_s4 + $0x10] sm:$0xff] }
  0x59   : > { %479 = vperm.xlu0 %753, %v457_v20  }
  0x5b   : > { %759 = vset.pattern.permute.xlu2 %v858_v4 }
  0x5c   : > { %758 = vset.pattern.permute.xlu1 %v857_v3 }
  0x5d   : > { %390 = vperm.xlu1 %758, %v284_v14  }
  0x61   : > { %464 = vperm.xlu0 %753, %v454_v21   ;;  %v461_v21 = vld [vmem:[%s1119_s4 + $0x38] sm:$0xff] }
  0x62   : > { %499 = vperm.xlu2 %759, %v461_v21  }
  0x65   : > { %760 = vset.pattern.permute.xlu1 %v858_v4 }
  0x66   : > { %489 = vperm.xlu1 %760, %v459_v12  }
  0x6e   : > { %474 = vperm.xlu1 %760, %v456_v19  }
  0x74   : > { %v320_v22 = vpop.permute.xlu2 %319 }
  0x75   : > { %v338_v44 = vmul.f32 %v1012_v27, %v320_v22 }
  0x7c   : > { %v374_v23 = vpop.permute.xlu2 %373 }
  0x84   : > { %v369_v31 = vpop.permute.xlu2 %368 }
  0x85   : > { %v386_v46 = vadd.f32 %v369_v31, %v338_v44 }
  0x8a   : > { %v379_v24 = vpop.permute.xlu1 %378  ;;  %v415_v25 = vpop.permute.xlu0 %414 }
  0x8b   : > { %v428_v37 = vmul.f32 %v1014_v28, %v415_v25 }
  0x8c   : > { %v310_v40 = vpop.permute.xlu2 %309 }
  0x8d   : > { %v336_v59 = vmul.f32 %v1012_v27, %v310_v40 }
  0x93   : > { %v330_v29 = vpop.permute.xlu0 %329  ;;  %v419_v30 = vpop.permute.xlu1 %418 }
  0x94   : > { %v340_v32 = vmul.f32 %v1012_v27, %v330_v29  ;;  %v429_v34 = vmul.f32 %v1014_v28, %v419_v30  ;;  %v305_v49 = vpop.permute.xlu2 %304  ;;  %v577_v29 = vld [vmem:[#allocation2] sm:$0x1] }
  0x95   : > { %v335_v3 = vmul.f32 %v1012_v27, %v305_v49  ;;  %580 = vperm.xlu1 %760, %v577_v29   ;;  %v446_v30 = vld [vmem:[%s1118_s3] sm:$0xff] }
  0x96   : > { %v388_v33 = vadd.f32 %v379_v24, %v340_v32  ;;  %v451_v32 = vld [vmem:[%s1118_s3 + $0x28] sm:$0xff] }
  0x98   : > { %v437_v35 = vadd.f32 %v429_v34, %v388_v33  ;;  %v455_v33 = vld [vmem:[%s1119_s4 + $0x8] sm:$0xff] }
  0x99   : > { %v447_v34 = vld [vmem:[%s1118_s3 + $0x8] sm:$0xff] }
  0x9a   : > { %761 = vtanh.f32 %v437_v35  ;;  %v449_v35 = vld [vmem:[%s1118_s3 + $0x18] sm:$0xff] }
  0x9b   : > { %v325_v36 = vpop.permute.xlu0 %324 }
  0x9c   : > { %v339_v38 = vmul.f32 %v1012_v27, %v325_v36  ;;  %v315_v39 = vpop.permute.xlu1 %314  ;;  %v452_v36 = vld [vmem:[%s1118_s3 + $0x30] sm:$0xff] }
  0x9d   : > { %v337_v52 = vmul.f32 %v1012_v27, %v315_v39  ;;  %v403_v58 = vpop.permute.xlu2 %402 }
  0x9e   : > { %v387_v41 = vadd.f32 %v374_v23, %v339_v38  ;;  %v425_v60 = vmul.f32 %v1014_v28, %v403_v58  ;;  %v453_v38 = vld [vmem:[%s1118_s3 + $0x38] sm:$0xff] }
  0xa0   : > { %v762_v42 = vpop.eup %761  ;;  %v436_v43 = vadd.f32 %v428_v37, %v387_v41  ;;  %v450_v37 = vld [vmem:[%s1118_s3 + $0x20] sm:$0xff] }
  0xa1   : > { %535 = vmatpush.msra.mxu0 %v762_v42  ;;  %692 = vmatpush.msra.mxu2 %v762_v42 }
  0xa2   : > { %763 = vtanh.f32 %v436_v43  ;;  %693 = vmatpush.msra.mxu3 %v762_v42 }
  0xa3   : > { %v364_v51 = vpop.permute.xlu0 %363 }
  0xa4   : > { %v385_v54 = vadd.f32 %v364_v51, %v337_v52 }
  0xa5   : > { %v411_v45 = vpop.permute.xlu1 %410  ;;  %v399_v2 = vpop.permute.xlu2 %398 }
  0xa6   : > { %v427_v47 = vmul.f32 %v1014_v28, %v411_v45  ;;  %v424_v4 = vmul.f32 %v1014_v28, %v399_v2 }
  0xa8   : > { %v764_v48 = vpop.eup %763  ;;  %v435_v50 = vadd.f32 %v427_v47, %v386_v46 }
  0xa9   : > { %536 = vmatpush.msra.mxu0 %v764_v48  ;;  %694 = vmatpush.msra.mxu2 %v764_v48 }
  0xaa   : > { %765 = vtanh.f32 %v435_v50  ;;  %695 = vmatpush.msra.mxu3 %v764_v48 }
  0xab   : > { %v300_v0 = vpop.permute.xlu0 %299 }
  0xac   : > { %v334_v11 = vmul.f32 %v1012_v27, %v300_v0 }
  0xad   : > { %v407_v53 = vpop.permute.xlu1 %406  ;;  %v395_v10 = vpop.permute.xlu2 %394 }
  0xae   : > { %v426_v55 = vmul.f32 %v1014_v28, %v407_v53  ;;  %v423_v14 = vmul.f32 %v1014_v28, %v395_v10 }
  0xb0   : > { %v766_v56 = vpop.eup %765  ;;  %v434_v57 = vadd.f32 %v426_v55, %v385_v54 }
  0xb1   : > { %537 = vmatpush.msra.mxu0 %v766_v56  ;;  %696 = vmatpush.msra.mxu2 %v766_v56 }
  0xb2   : > { %767 = vtanh.f32 %v434_v57  ;;  %697 = vmatpush.msra.mxu3 %v766_v56 }
  0xb3   : > { %v295_v9 = vpop.permute.xlu0 %294 }
  0xb4   : > { %v333_v20 = vmul.f32 %v1012_v27, %v295_v9  ;;  %v458_v27 = vld [vmem:[%s1119_s4 + $0x20] sm:$0xff] }
  0xb5   : > { %484 = vperm.xlu2 %759, %v458_v27  }
  0xb6   : > { %v359_v61 = vpop.permute.xlu1 %358 }
  0xb7   : > { %v384_v62 = vadd.f32 %v359_v61, %v336_v59 }
  0xb8   : > { %v768_v63 = vpop.eup %767 }
  0xb9   : > { %v433_v1 = vadd.f32 %v425_v60, %v384_v62  ;;  %538 = vmatpush.msra.mxu0 %v768_v63  ;;  %698 = vmatpush.msra.mxu2 %v768_v63 }
  0xba   : > { %699 = vmatpush.msra.mxu3 %v768_v63 }
  0xbb   : > { %769 = vtanh.f32 %v433_v1  ;;  %v344_v18 = vpop.permute.xlu0 %343 }
  0xbc   : > { %v381_v23 = vadd.f32 %v344_v18, %v333_v20  ;;  %v500_v41 = vpop.permute.xlu2 %499 }
  0xbd   : > { %469 = vperm.xlu2 %759, %v455_v33  }
  0xbe   : > { %v354_v5 = vpop.permute.xlu1 %353 }
  0xbf   : > { %v383_v6 = vadd.f32 %v354_v5, %v335_v3 }
  0xc1   : > { %v770_v7 = vpop.eup %769  ;;  %v432_v8 = vadd.f32 %v424_v4, %v383_v6  ;;  %v576_v6 = vld [vmem:[%s1120_s5] sm:$0x1] }
  0xc2   : > { %539 = vmatpush.msra.mxu0 %v770_v7  ;;  %700 = vmatpush.msra.mxu2 %v770_v7 }
  0xc3   : > { %771 = vtanh.f32 %v432_v8  ;;  %701 = vmatpush.msra.mxu3 %v770_v7  ;;  %v495_v43 = vpop.permute.xlu0 %494 }
  0xc6   : > { %v349_v13 = vpop.permute.xlu1 %348 }
  0xc7   : > { %v382_v15 = vadd.f32 %v349_v13, %v334_v11 }
  0xc9   : > { %v772_v16 = vpop.eup %771  ;;  %v431_v17 = vadd.f32 %v423_v14, %v382_v15 }
  0xca   : > { %540 = vmatpush.msra.mxu0 %v772_v16  ;;  %702 = vmatpush.msra.mxu2 %v772_v16 }
  0xcb   : > { %773 = vtanh.f32 %v431_v17  ;;  %703 = vmatpush.msra.mxu3 %v772_v16  ;;  %v480_v51 = vpop.permute.xlu0 %479 }
  0xcf   : > { %v391_v22 = vpop.permute.xlu1 %390 }
  0xd0   : > { %v422_v24 = vmul.f32 %v1014_v28, %v391_v22  ;;  %v448_v28 = vld [vmem:[%s1118_s3 + $0x10] sm:$0xff] }
  0xd1   : > { %v774_v25 = vpop.eup %773 }
  0xd2   : > { %v430_v26 = vadd.f32 %v422_v24, %v381_v23  ;;  %541 = vmatpush.msra.mxu0 %v774_v25  ;;  %704 = vmatpush.msra.mxu2 %v774_v25 }
  0xd3   : > { %705 = vmatpush.msra.mxu3 %v774_v25  ;;  %v465_v63 = vpop.permute.xlu0 %464 }
  0xd4   : > { %775 = vtanh.f32 %v430_v26 }
  0xd8   : > { %v490_v45 = vpop.permute.xlu1 %489 }
  0xda   : > { %v776_v31 = vpop.eup %775 }
  0xdb   : > { %542 = vmatpush.msra.mxu0 %v776_v31  ;;  %706 = vmatpush.msra.mxu2 %v776_v31 }
  0xdc   : > { %707 = vmatpush.msra.mxu3 %v776_v31  ;;  %681 = vmatmul.msk.f32.vlgmr.msra.gmra.mxu0 %vm502_vm0, %v446_v30 }
  0xdd   : > { %683 = vmatmul.msk.f32.vlgmr.msra.gmra.mxu2 %vm502_vm0, %v448_v28  ;;  %686 = vmatmul.msk.f32.vlgmr.msra.gmra.mxu3 %vm502_vm0, %v451_v32 }
  0xe0   : > { %v475_v55 = vpop.permute.xlu1 %474 }
  0xe4   : > { %682 = vmatmul.msk.f32.gmra.mxu0 %vm502_vm0, %v447_v34 }
  0xe5   : > { %684 = vmatmul.msk.f32.gmra.mxu2 %vm502_vm0, %v449_v35  ;;  %687 = vmatmul.msk.f32.gmra.mxu3 %vm502_vm0, %v452_v36 }
  0xed   : > { %685 = vmatmul.msk.f32.gmra.mxu2 %vm502_vm0, %v450_v37  ;;  %688 = vmatmul.msk.f32.gmra.mxu3 %vm502_vm0, %v453_v38 }
 0x107   : > { %v581_v8 = vpop.permute.xlu1 %580 }
 0x108   : > { %v583_v9 = vperm.slane %v581_v8, 0 }
 0x10f   : > { %v485_v46 = vpop.permute.xlu2 %484 }
 0x117   : > { %v470_v57 = vpop.permute.xlu2 %469 }
 0x159   : > { %v544_v48 = vpop.f32.mrf.mxu0 }
 0x15a   : > { %v545_v1 = vadd.f32 %v544_v48, %v465_v63 }
 0x160   : > { %v550_v39 = vpop.f32.mrf.mxu2  ;;  %v559_v40 = vpop.f32.mrf.mxu3 }
 0x161   : > { %v560_v53 = vadd.f32 %v559_v40, %v490_v45  ;;  %v547_v58 = vpop.f32.mrf.mxu0  ;;  %v551_v60 = vadd.f32 %v550_v39, %v475_v55 }
 0x162   : > { %v548_v62 = vadd.f32 %v547_v58, %v470_v57 }
 0x168   : > { %v562_v42 = vpop.f32.mrf.mxu3  ;;  %v553_v44 = vpop.f32.mrf.mxu2 }
 0x169   : > { %v563_v50 = vadd.f32 %v562_v42, %v495_v43  ;;  %v554_v56 = vadd.f32 %v553_v44, %v480_v51 }
 0x170   : > { %v565_v47 = vpop.f32.mrf.mxu3  ;;  %v556_v52 = vpop.f32.mrf.mxu2 }
 0x171   : > { %v566_v49 = vadd.f32 %v565_v47, %v500_v41  ;;  %v557_v54 = vadd.f32 %v556_v52, %v485_v46 }
 0x173   : > { %777 = vtanh.f32 %v566_v49 }
 0x174   : > { %779 = vtanh.f32 %v563_v50 }
 0x175   : > { %781 = vtanh.f32 %v560_v53 }
 0x176   : > { %783 = vtanh.f32 %v557_v54 }
 0x177   : > { %785 = vtanh.f32 %v554_v56 }
 0x178   : > { %787 = vtanh.f32 %v551_v60 }
 0x179   : > { %v778_v59 = vpop.eup %777  ;;  %789 = vtanh.f32 %v548_v62 }
 0x17a   : > { %595 = vmatpush.msra.mxu1 %v778_v59  ;;  %v780_v61 = vpop.eup %779  ;;  %791 = vtanh.f32 %v545_v1 }
 0x17b   : > { %v782_v0 = vpop.eup %781 }
 0x17c   : > { %596 = vmatpush.msra.mxu1 %v780_v61  ;;  %v784_v2 = vpop.eup %783 }
 0x17d   : > { %v786_v3 = vpop.eup %785 }
 0x17e   : > { %597 = vmatpush.msra.mxu1 %v782_v0  ;;  %v788_v4 = vpop.eup %787 }
 0x17f   : > { %v790_v5 = vpop.eup %789 }
 0x180   : > { %598 = vmatpush.msra.mxu1 %v784_v2  ;;  %v792_v7 = vpop.eup %791 }
 0x182   : > { %599 = vmatpush.msra.mxu1 %v786_v3 }
 0x184   : > { %600 = vmatpush.msra.mxu1 %v788_v4 }
 0x186   : > { %601 = vmatpush.msra.mxu1 %v790_v5 }
 0x188   : > { %602 = vmatpush.msra.mxu1 %v792_v7 }
 0x189   : > { %689 = vmatmul.msk.f32.vlgmr.msra.gmra.mxu1 %vm502_vm0, %v576_v6 }
 0x206   : > { %v604_v10 = vpop.f32.mrf.mxu1 }
 0x207   : > { %v605_v11 = vadd.f32 %v604_v10, %v583_v9 }
 0x209   : > { %607 = vst [vmem:[%s270_s14] sm:$0x1] %v605_v11 }
 0x20a   : > { %820 = shalt.err (!%p817_p3)
}
 0x20b   : > { %708 = dma.vmem_to_hbm [thread:$0]  (%p940_p5), %s620_s15, 16, %s622_s16, %s609_s17  }
 0x20c PF: > { %p714_p4 = scmp.ge.s32.totalorder %s855_s29, 2  ;;  %s633_s24 = sand.u32 1, %s843_s26  }
 0x20d   : > { %s634_s25 = scalar_lea.sflag [#allocation4], %s633_s24 }
 0x20e   : > { %p711_p7 = pnand %p714_p4, %p944_p6 }
 0x210   : > { %p712_p8 = pneg %p711_p7 }
 0x212   : > { %838 = dma.done.wait (%p712_p8), %s634_s25, 16  }
 0x213   : > { %840 = vsyncadd (%p712_p8), %s634_s25, 4294967280  ;;  %p19_p9 = scmp.ge.s32.totalorder %s927_s8, 4   ;;  %s1125_s26 = smov %s847_s27 }
 0x214   : > { %s1126_s27 = smov %s851_s28  ;;  %s1127_s28 = smov %s938_s11 }
 0x215   : > { %s1128_s29 = smov %s927_s8  ;;  %21 = sbr.rel (!%p19_p9) target bundleno = 6 (0x6), region = 83 }
 0x21a   :  { %639 = vsyncpa [#allocation4], 1 }
 0x21b   :  { %641 = vsyncpa [#allocation4 + $0x1], 1 }

</bundles_post_ra>
